<compile_context>
chip_gen: v7x
topology: tpu7x:2x2x1
jax: 0.10.0
libtpu: 0.0.40
codegen_flags: <defaults>
</compile_context>

<pallas_src>
import jax
import jax.numpy as jnp
from jax.experimental import pallas as pl
from jax.experimental.pallas import tpu as pltpu


# ---------------------------------------------------------------------------
# Kernel: one (batch, spatial-tile) block of the whole residual basic block.
# ---------------------------------------------------------------------------
def _resblock_kernel(x_ref, w1_ref, b1_ref, w2_ref, b2_ref, o_ref):
    x = x_ref[0]                                    # (C, TL) f32  (identity)
    xb = x.astype(jnp.bfloat16)

    # conv1 (k=1) + folded bn1 + ReLU
    h = jnp.dot(w1_ref[...], xb, preferred_element_type=jnp.float32)   # (C, TL)
    h = jnp.maximum(h + b1_ref[...], 0.0)

    # conv2 (k=1) + folded bn2
    y = jnp.dot(w2_ref[...], h.astype(jnp.bfloat16),
                preferred_element_type=jnp.float32)                    # (C, TL)
    y = y + b2_ref[...]

    # residual + ReLU
    o_ref[0] = jnp.maximum(y + x, 0.0).astype(o_ref.dtype)


# ---------------------------------------------------------------------------
# Wrapper
# ---------------------------------------------------------------------------
def resnet_basic_block(x, folded_params, *, tile_l=128):
    """x: (B, C, L) f32. folded_params = (w1f bf16 (C,C), b1f f32 (C,1),
                                          w2f bf16 (C,C), b2f f32 (C,1)).
    Returns (B, C, L) f32."""
    w1f, b1f, w2f, b2f = folded_params
    B, C, L = x.shape
    TL = tile_l if (L % tile_l == 0) else L        # keep lane dim a multiple of 128
    grid = (B, L // TL)

    flops = 4 * B * L * C * C                      # two matmuls: 2*C*C flops / out elem each
    bytes_accessed = (2 * B * C * L) * 4 + (w1f.size + w2f.size) * 2 \
                     + (b1f.size + b2f.size) * 4

    return pl.pallas_call(
        _resblock_kernel,
        out_shape=jax.ShapeDtypeStruct((B, C, L), jnp.float32),
        grid_spec=pltpu.PrefetchScalarGridSpec(
            num_scalar_prefetch=0,
            grid=grid,
            in_specs=[
                pl.BlockSpec((1, C, TL), lambda b, j: (b, 0, j)),   # x tile
                pl.BlockSpec((C, C), lambda b, j: (0, 0)),          # w1f (resident)
                pl.BlockSpec((C, 1), lambda b, j: (0, 0)),          # b1f (resident)
                pl.BlockSpec((C, C), lambda b, j: (0, 0)),          # w2f (resident)
                pl.BlockSpec((C, 1), lambda b, j: (0, 0)),          # b2f (resident)
            ],
            out_specs=pl.BlockSpec((1, C, TL), lambda b, j: (b, 0, j)),
        ),
        compiler_params=pltpu.CompilerParams(
            dimension_semantics=("parallel", "parallel")),
        cost_estimate=pl.CostEstimate(
            flops=flops, transcendentals=0, bytes_accessed=bytes_accessed),
    )(x, w1f, b1f, w2f, b2f)


# ---------------------------------------------------------------------------
# Parameter prep (done ONCE, outside the hot path)
# ---------------------------------------------------------------------------
def fold_params(raw_params, eps=1e-5):
    """Fold eval-mode BatchNorm into the k=1 convs; weights -> bf16, biases -> f32 (C,1)."""
    (w1, b1, g1, be1, m1, v1,
     w2, b2, g2, be2, m2, v2) = raw_params
    s1 = g1 / jnp.sqrt(v1 + eps)
    s2 = g2 / jnp.sqrt(v2 + eps)
    w1f = (s1[:, None] * w1[:, :, 0]).astype(jnp.bfloat16)        # (C, C)
    b1f = (s1 * (b1 - m1) + be1).reshape(-1, 1).astype(jnp.float32)
    w2f = (s2[:, None] * w2[:, :, 0]).astype(jnp.bfloat16)        # (C, C)
    b2f = (s2 * (b2 - m2) + be2).reshape(-1, 1).astype(jnp.float32)
    return w1f, b1f, w2f, b2f


def init_params(key, inplanes, planes, kernel_size=1):
    """Deterministic synthetic params matching nn.Conv1d / nn.BatchNorm1d shapes."""
    ks = jax.random.split(key, 12)

    def conv(kw, kb, cin, cout):
        bound = 1.0 / jnp.sqrt(cin * kernel_size)
        w = jax.random.uniform(kw, (cout, cin, kernel_size), jnp.float32, -bound, bound)
        b = jax.random.uniform(kb, (cout,), jnp.float32, -bound, bound)
        return w, b

    def bn(kg, kb, km, kv, c):
        g = jax.random.uniform(kg, (c,), jnp.float32, 0.5, 1.5)
        be = jax.random.uniform(kb, (c,), jnp.float32, -0.1, 0.1)
        m = 0.1 * jax.random.normal(km, (c,), jnp.float32)
        v = jax.random.uniform(kv, (c,), jnp.float32, 0.5, 1.5)
        return g, be, m, v

    w1, b1 = conv(ks[0], ks[1], inplanes, planes)
    g1, be1, m1, v1 = bn(ks[2], ks[3], ks[4], ks[5], planes)
    w2, b2 = conv(ks[6], ks[7], planes, planes)
    g2, be2, m2, v2 = bn(ks[8], ks[9], ks[10], ks[11], planes)
    return (w1, b1, g1, be1, m1, v1, w2, b2, g2, be2, m2, v2)


# ---------------------------------------------------------------------------
# References
# ---------------------------------------------------------------------------
def reference_f32(x, raw_params, eps=1e-5):
    """Exact module math in f32 (eval-mode BN)."""
    (w1, b1, g1, be1, m1, v1,
     w2, b2, g2, be2, m2, v2) = raw_params

    def bn(y, g, be, m, v):
        return (y - m[None, :, None]) * (g / jnp.sqrt(v + eps))[None, :, None] \
               + be[None, :, None]

    h = jnp.einsum('oi,bil->bol', w1[:, :, 0], x) + b1[None, :, None]
    h = jnp.maximum(bn(h, g1, be1, m1, v1), 0.0)
    y = jnp.einsum('oi,bil->bol', w2[:, :, 0], h) + b2[None, :, None]
    y = bn(y, g2, be2, m2, v2)
    return jnp.maximum(y + x, 0.0)


def reference_kernel_math(x, folded_params):
    """Same numerics as the kernel (bf16 operands, f32 accumulation)."""
    w1f, b1f, w2f, b2f = folded_params
    xb = x.astype(jnp.bfloat16)
    h = jnp.einsum('oi,bil->bol', w1f, xb, preferred_element_type=jnp.float32)
    h = jnp.maximum(h + b1f.reshape(1, -1, 1), 0.0)
    y = jnp.einsum('oi,bil->bol', w2f, h.astype(jnp.bfloat16),
                   preferred_element_type=jnp.float32)
    y = y + b2f.reshape(1, -1, 1)
    return jnp.maximum(y + x, 0.0)


# ---------------------------------------------------------------------------
if __name__ == "__main__":
    key = jax.random.PRNGKey(0)
    B, C, L = 2, 64, 256                     # inplanes == planes (required by residual)

    kx, kp = jax.random.split(key)
    x = jax.random.normal(kx, (B, C, L), jnp.float32)
    raw_params = init_params(kp, C, C)
    folded = fold_params(raw_params)         # one-time prep (no per-call transposes)

    out = jax.jit(resnet_basic_block)(x, folded)
    out = jax.block_until_ready(out)
    assert out.shape == (B, C, L)

    # Tight check against identical-precision math (validates the kernel itself).
    ref_bf16 = reference_kernel_math(x, folded)
    assert jnp.allclose(out, ref_bf16, atol=1e-3, rtol=1e-3)

    # Loose check against the exact f32 module semantics (validates bf16 trade-off).
    ref_f32 = reference_f32(x, raw_params)
    assert jnp.allclose(out, ref_f32, atol=2e-2, rtol=2e-2)

    print("KERNEL_OK")
</pallas_src>

<mosaic_0001>
module attributes {stable_mosaic.version = 11 : i64} {
  func.func @_resblock_kernel(%arg0: i32, %arg1: i32, %arg2: memref<1x64x128xf32, #tpu.memory_space<vmem>>, %arg3: memref<64x64xbf16, #tpu.memory_space<vmem>>, %arg4: memref<64x1xf32, #tpu.memory_space<vmem>>, %arg5: memref<64x64xbf16, #tpu.memory_space<vmem>>, %arg6: memref<64x1xf32, #tpu.memory_space<vmem>>, %arg7: memref<1x64x128xf32, #tpu.memory_space<vmem>>) attributes {dimension_semantics = [#tpu.dimension_semantics<parallel>, #tpu.dimension_semantics<parallel>], iteration_bounds = array<i64: 2, 2>, scalar_prefetch = 0 : i64, scratch_operands = 0 : i64, tpu.core_type = #tpu.core_type<tc>, window_params = [{transform_indices = @transform_0, window_bounds = array<i64: 1, 64, 128>}, {pipeline_mode = #tpu.pipeline_mode<synchronous>, transform_indices = @transform_1, window_bounds = array<i64: 64, 64>}, {pipeline_mode = #tpu.pipeline_mode<synchronous>, transform_indices = @transform_2, window_bounds = array<i64: 64, 1>}, {pipeline_mode = #tpu.pipeline_mode<synchronous>, transform_indices = @transform_3, window_bounds = array<i64: 64, 64>}, {pipeline_mode = #tpu.pipeline_mode<synchronous>, transform_indices = @transform_4, window_bounds = array<i64: 64, 1>}, {transform_indices = @transform_5, window_bounds = array<i64: 1, 64, 128>}]} {
    %c0 = arith.constant 0 : index
    %c0_0 = arith.constant 0 : index
    %c0_1 = arith.constant 0 : index
    %0 = vector.load %arg2[%c0, %c0_0, %c0_1] : memref<1x64x128xf32, #tpu.memory_space<vmem>>, vector<1x64x128xf32>
    %1 = vector.shape_cast %0 : vector<1x64x128xf32> to vector<64x128xf32>
    %2 = arith.truncf %1 : vector<64x128xf32> to vector<64x128xbf16>
    %c0_2 = arith.constant 0 : index
    %c0_3 = arith.constant 0 : index
    %3 = vector.load %arg3[%c0_2, %c0_3] : memref<64x64xbf16, #tpu.memory_space<vmem>>, vector<64x64xbf16>
    %cst = arith.constant dense<0.000000e+00> : vector<64x128xf32>
    %4 = tpu.matmul %3, %2, %cst {dimension_numbers = #tpu.dot_dimension_numbers<[1], [0], [0], [1], [0, 0, 1, 1], [], []>} : vector<64x64xbf16>, vector<64x128xbf16>, vector<64x128xf32> -> vector<64x128xf32>
    %c0_4 = arith.constant 0 : index
    %c0_5 = arith.constant 0 : index
    %5 = vector.load %arg4[%c0_4, %c0_5] : memref<64x1xf32, #tpu.memory_space<vmem>>, vector<64x1xf32>
    %6 = vector.broadcast %5 : vector<64x1xf32> to vector<64x128xf32>
    %7 = arith.addf %4, %6 : vector<64x128xf32>
    %cst_6 = arith.constant 0.000000e+00 : f32
    %8 = vector.broadcast %cst_6 : f32 to vector<64x128xf32>
    %9 = arith.maximumf %7, %8 : vector<64x128xf32>
    %c0_7 = arith.constant 0 : index
    %c0_8 = arith.constant 0 : index
    %10 = vector.load %arg5[%c0_7, %c0_8] : memref<64x64xbf16, #tpu.memory_space<vmem>>, vector<64x64xbf16>
    %11 = arith.truncf %9 : vector<64x128xf32> to vector<64x128xbf16>
    %cst_9 = arith.constant dense<0.000000e+00> : vector<64x128xf32>
    %12 = tpu.matmul %10, %11, %cst_9 {dimension_numbers = #tpu.dot_dimension_numbers<[1], [0], [0], [1], [0, 0, 1, 1], [], []>} : vector<64x64xbf16>, vector<64x128xbf16>, vector<64x128xf32> -> vector<64x128xf32>
    %c0_10 = arith.constant 0 : index
    %c0_11 = arith.constant 0 : index
    %13 = vector.load %arg6[%c0_10, %c0_11] : memref<64x1xf32, #tpu.memory_space<vmem>>, vector<64x1xf32>
    %14 = vector.broadcast %13 : vector<64x1xf32> to vector<64x128xf32>
    %15 = arith.addf %12, %14 : vector<64x128xf32>
    %16 = arith.addf %15, %1 : vector<64x128xf32>
    %cst_12 = arith.constant 0.000000e+00 : f32
    %17 = vector.broadcast %cst_12 : f32 to vector<64x128xf32>
    %18 = arith.maximumf %16, %17 : vector<64x128xf32>
    %c0_13 = arith.constant 0 : index
    %c0_14 = arith.constant 0 : index
    %c0_15 = arith.constant 0 : index
    %19 = vector.load %arg7[%c0_13, %c0_14, %c0_15] : memref<1x64x128xf32, #tpu.memory_space<vmem>>, vector<1x64x128xf32>
    %20 = vector.shape_cast %19 : vector<1x64x128xf32> to vector<64x128xf32>
    %21 = vector.shape_cast %18 : vector<64x128xf32> to vector<1x64x128xf32>
    tpu.vector_store %arg7[%c0_13, %c0_14, %c0_15], %21 {strides = array<i32>} : memref<1x64x128xf32, #tpu.memory_space<vmem>>, vector<1x64x128xf32>,
    return
  }
  func.func @transform_0(%arg0: i32, %arg1: i32) -> (i32, i32, i32) {
    %c0_i32 = arith.constant 0 : i32
    %c0_i32_0 = arith.constant 0 : i32
    return %arg0, %c0_i32, %arg1 : i32, i32, i32
  }
  func.func @transform_1(%arg0: i32, %arg1: i32) -> (i32, i32) {
    %c0_i32 = arith.constant 0 : i32
    %c0_i32_0 = arith.constant 0 : i32
    %c0_i32_1 = arith.constant 0 : i32
    return %c0_i32, %c0_i32_0 : i32, i32
  }
  func.func @transform_2(%arg0: i32, %arg1: i32) -> (i32, i32) {
    %c0_i32 = arith.constant 0 : i32
    %c0_i32_0 = arith.constant 0 : i32
    %c0_i32_1 = arith.constant 0 : i32
    return %c0_i32, %c0_i32_0 : i32, i32
  }
  func.func @transform_3(%arg0: i32, %arg1: i32) -> (i32, i32) {
    %c0_i32 = arith.constant 0 : i32
    %c0_i32_0 = arith.constant 0 : i32
    %c0_i32_1 = arith.constant 0 : i32
    return %c0_i32, %c0_i32_0 : i32, i32
  }
  func.func @transform_4(%arg0: i32, %arg1: i32) -> (i32, i32) {
    %c0_i32 = arith.constant 0 : i32
    %c0_i32_0 = arith.constant 0 : i32
    %c0_i32_1 = arith.constant 0 : i32
    return %c0_i32, %c0_i32_0 : i32, i32
  }
  func.func @transform_5(%arg0: i32, %arg1: i32) -> (i32, i32, i32) {
    %c0_i32 = arith.constant 0 : i32
    %c0_i32_0 = arith.constant 0 : i32
    return %arg0, %c0_i32, %arg1 : i32, i32, i32
  }
}

</mosaic_0001>

<bundles_post_ra>
// kernel: resnet_basic_block.1
= control target key start
LH: loop header
LB: loop body
LE: loop exit
PB: predicated region body
PF: predicated region fallthrough
CT: control target
= control target key end

     0   :  { %10 = vsyncpa [#allocation3], 0  ;;  %s1384_s0 = inlined_call_operand.hbm [shape: f32[2,64,256], index: 0, kind: input, shape index: {}]   ;;  %s1385_s1 = inlined_call_operand.vmem [shape: bf16[64,64], index: 1, kind: input, shape index: {}]   ;;  %s1386_s2 = inlined_call_operand.vmem [shape: f32[64,1], index: 2, kind: input, shape index: {}]   ;;  %s1387_s3 = inlined_call_operand.vmem [shape: bf16[64,64], index: 3, kind: input, shape index: {}]   ;;  %s1388_s4 = inlined_call_operand.vmem [shape: f32[64,1], index: 4, kind: input, shape index: {}]   ;;  %s1389_s5 = inlined_call_operand.hbm [shape: f32[2,64,256], index: 5, kind: output, shape index: {}]  }
   0x1   :  { %12 = vsyncpa [#allocation3 + $0x1], 0 }
   0x2   :  { %13 = vsyncpa [#allocation4], 0 }
   0x3   :  { %15 = vsyncpa [#allocation4 + $0x1], 0  ;;  %s1062_s18 = smov 0   ;;  %s1064_s19 = smov 0  }
   0x4   :  { %s1066_s20 = smov 0   ;;  %s1068_s21 = smov 0  }
   0x5   :  { %s1070_s22 = smov 0   ;;  %s1072_s23 = smov 0  }
   0x6   :  { %s1074_s24 = smov 0   ;;  %s1076_s25 = smov 0  }
   0x7 LB: > { %1394 = sst [smem:[#allocation8_spill]] %s993_s18  ;;  %s719_s26 = sadd.s32 4294967295, %s1021_s25   ;;  %s1021_s25 = sphi %s1076_s25, %s21_s25   ;;  %s1017_s24 = sphi %s1074_s24, %s1413_s24   ;;  %s1013_s23 = sphi %s1072_s23, %s1412_s23   ;;  %s1009_s22 = sphi %s1070_s22, %s1411_s22   ;;  %s1005_s21 = sphi %s1068_s21, %s1410_s21   ;;  %s1001_s20 = sphi %s1066_s20, %s1409_s20   ;;  %s997_s19 = sphi %s1064_s19, %s1408_s19   ;;  %s993_s18 = sphi %s1062_s18, %s1407_s18  }
   0x8   : > { %s720_s27 = sadd.s32 4294967294, %s1021_s25   ;;  %s30_s28 = sadd.s32 1, %s1013_s23 }
   0x9   : > { %s33_s29 = sadd.s32 1, %s1017_s24  ;;  %p31_p0 = scmp.ge.s32.totalorder %s30_s28, 2 }
   0xa   : > { %s42_s30 = sadd.s32 1, %s1001_s20  ;;  %p49_p1 = scmp.ne.s32.totalorder %s1001_s20, %s997_s19 }
   0xb   : > { %p50_p2 = scmp.eq.s32.totalorder %s1021_s25, 0  ;;  %s1415_s28 = smov (%p31_p0, %s30_s28), 0 }
   0xc   : > { %1395 = sst [smem:[#allocation9_spill]] %s1415_s28  ;;  %s1417_s29 = smov (!%p31_p0, %s33_s29), %s1017_s24 }
   0xd   : > { %s38_s6 = ssub.s32 %s1013_s23, %s1415_s28  ;;  %p1115_p3 = por %p50_p2, %p49_p1 }
   0xe   : > { %p35_p4 = scmp.ge.s32.totalorder %s1417_s29, 2  ;;  %p55_p5 = scmp.ne.s32.totalorder %s997_s19, %s993_s18 }
   0xf   : > { %p56_p6 = scmp.eq.s32.totalorder %s719_s26, 0  ;;  %p165_p7 = scmp.eq.s32.totalorder %s719_s26, 3 }
  0x10   : > { %s1419_s29 = smov (%p35_p4, %s1417_s29), 0  ;;  %p171_p10 = scmp.eq.s32.totalorder %s720_s27, 3 }
  0x11   : > { %1397 = sst [smem:[#allocation10_spill]] %s1419_s29  ;;  %p1123_p8 = por %p56_p6, %p55_p5 }
  0x12   : > { %p1127_p9 = por %p165_p7, %p49_p1  ;;  %s37_s10 = ssub.s32 %s1017_s24, %s1419_s29 }
  0x13   : > { %s39_s11 = sor.u32 %s38_s6, %s37_s10  ;;  %p1133_p12 = por %p171_p10, %p55_p5 }
  0x14   : > { %s1399_s9 = scalar_select %p1127_p9, 1, 0 }
  0x15   : > { %p40_p11 = scmp.eq.s32.totalorder %s39_s11, 0  ;;  %p810_p13 = scmp.lt.s32.totalorder %s1021_s25, 4 }
  0x16   : > { %s1400_s12 = scalar_select %p1133_p12, 1, 0 }
  0x17   : > { %s203_s13 = sand.u32 1, %s1001_s20   ;;  %s724_s16 = sshll.u32 %s1017_s24, 4 }
  0x18   : > { %s1140_s14 = scalar_select %p40_p11, %s1001_s20, %s42_s30  }
  0x19   : > { %s723_s15 = sshll.u32 %s203_s13, 6  ;;  %s212_s17 = sadd.s32 %s1013_s23, %s724_s16 }
  0x1a   : > { %s207_s26 = scalar_lea.vmem [#allocation2], %s723_s15  ;;  %s725_s18 = sshll.u32 %s212_s17, 7 }
  0x1b   : > { %s215_s28 = sshll.u32 %s207_s26, 4  ;;  %s1149_s6 = scalar_lea.hbm %s1384_s0, %s725_s18  ;;  %s1144_s28 = int_to_ptr.vmem [resolvable:$true] %s215_s28 }
  0x1c   : > { %p1153_p0 = pnand %p810_p13, %p1115_p3  ;;  %s1157_s10 = scalar_lea.sflag [#allocation3], %s203_s13 }
  0x1d   : > { %s893_s11 = scalar_lea.hbm %s1149_s6, 1024  ;;  %s898_s7 = scalar_lea.hbm %s1384_s0, 4096 }
  0x1e   : > { %p894_p1 = scmp.ne.s32.totalorder %s1149_s6, %s893_s11  ;;  %p895_p2 = pneg %p1153_p0 }
  0x1f   : > { %p899_p3 = scmp.lt.u32.totalorder %s1149_s6, %s1384_s0  ;;  %p900_p6 = scmp.lt.u32.totalorder %s898_s7, %s893_s11 }
  0x20   : > { %p896_p4 = pnand %p895_p2, %p894_p1  ;;  %p902_p10 = scmp.lt.u32.totalorder %s893_s11, %s1149_s6 }
  0x21   : > { %p901_p7 = por %p900_p6, %p899_p3 }
  0x22   : > { %p897_p5 = pneg %p896_p4 }
  0x23   : > { %p903_p11 = por %p902_p10, %p901_p7 }
  0x25   : > { %p904_p13 = pnand %p903_p11, %p897_p5 }
  0x27   : > { %907 = shalt.err (!%p904_p13)
}
  0x28   : > { %s908_s13 = scalar_lea.vmem %s1144_s28, 1024  ;;  %s1023_s17 = smov [#allocation2]  }
  0x29   : > { %p909_p1 = scmp.ne.s32.totalorder %s1144_s28, %s908_s13  ;;  %s913_s26 = sshll.u32 %s1023_s17, 4  ;;  %s914_s26 = int_to_ptr.vmem [resolvable:$false] %s913_s26 }
  0x2a   : > { %s915_s27 = scalar_lea.vmem %s914_s26, 2048  ;;  %p916_p9 = scmp.lt.s32.totalorder %s1144_s28, %s914_s26 }
  0x2b   : > { %p911_p4 = pnand %p909_p1, %p895_p2  ;;  %p917_p3 = scmp.lt.s32.totalorder %s915_s27, %s908_s13 }
  0x2d   : > { %p912_p12 = pneg %p911_p4  ;;  %p918_p6 = por %p917_p3, %p916_p9 }
  0x2f   : > { %p919_p7 = pnand %p918_p6, %p912_p12 }
  0x31   : > { %922 = shalt.err (!%p919_p7)
}
  0x32   : > { %s1024_s11 = smov 256   ;;  %s1025_s18 = smov 128  }
  0x33   : > { %s1026_s29 = smov 8   ;;  %p726_p2 = scmp.ge.s32.totalorder %s1021_s25, 1 }
  0x34   : > { %805 = dma.hbm_to_vmem [thread:$0]  (!%p1153_p0), %s1149_s6, 1024, %s1144_s28, %s1157_s10, %s1024_s11, %s1025_s18, %s1026_s29  }
  0x35   : > { %p223_p5 = scmp.lt.s32.totalorder %s1021_s25, 5 }
  0x37   : > { %p224_p10 = pnand %p726_p2, %p223_p5 }
  0x38   : > { %s1188_s7 = sand.u32 (!%p224_p10), 1, %s997_s19  }
  0x39   : > { %227 = sbr.rel (%p224_p10) target bundleno = 566 (0x236), region = 40  ;;  %s727_s15 = sshll.u32 (!%p224_p10), %s1188_s7, 6 }
  0x3a   : > { %s230_s16 = scalar_lea.sflag (!%p224_p10), [#allocation3], %s1188_s7  ;;  %s233_s13 = scalar_lea.vmem (!%p224_p10), [#allocation2], %s727_s15 }
  0x40   : > { %984 = dma.done.wait (%p1123_p8), %s230_s16, 1024  }
  0x41   : > { %986 = vsyncadd (%p1123_p8), %s230_s16, 4294966272  ;;  %v1027_v0 = vmov 0   ;;  %v1198_v1 = vld [vmem:[%s233_s13] sm:$0xff]  ;;  %v1200_v2 = vld [vmem:[%s233_s13 + $0x8] sm:$0xff]  ;;  %vm349_vm0 = vcmask 523264   ;;  %s746_s18 = sshll.u32 %s1009_s22, 4 }
  0x42   : > { %883 = vset.pattern.permute.xlu0 %v1027_v0  ;;  %884 = vset.pattern.permute.xlu1 %v1027_v0  ;;  %v1202_v3 = vld [vmem:[%s233_s13 + $0x10] sm:$0xff]  ;;  %v269_v4 = vpack.c.bf16 %v1200_v2, %v1198_v1  ;;  %v1206_v5 = vld [vmem:[%s233_s13 + $0x18] sm:$0xff]  ;;  %v1210_v7 = vld [vmem:[%s233_s13 + $0x20] sm:$0xff]  ;;  %s1309_s29 = scalar_lea.vmem [#allocation5], %s727_s15  ;;  %s628_s16 = sadd.s32 %s1005_s21, %s746_s18 }
  0x43   : > { %v270_v6 = vpack.c.bf16 %v1206_v5, %v1202_v3  ;;  %v1212_v8 = vld [vmem:[%s233_s13 + $0x28] sm:$0xff]  ;;  %v885_v9 = vld [vmem:[%s1385_s1] sm:$0xff]   ;;  %v1219_v11 = vld [vmem:[%s233_s13 + $0x30] sm:$0xff]  ;;  %s631_s22 = sshll.u32 %s1309_s29, 4  ;;  %s747_s15 = sshll.u32 %s628_s16, 7  ;;  %s1320_s22 = int_to_ptr.vmem [resolvable:$true] %s631_s22 }
  0x44   : > { %766 = vmatprep.subr.bf16.mxu0 %v269_v4  ;;  %v271_v10 = vpack.c.bf16 %v1212_v8, %v1210_v7  ;;  %774 = vmatprep.mubr.msk.bf16.mxu0 %vm349_vm0, %v885_v9  ;;  %v1222_v12 = vld [vmem:[%s233_s13 + $0x38] sm:$0xff]  ;;  %v281_v13 = vld [vmem:[%s1386_s2] sm:$0xff]  ;;  %v283_v14 = vld [vmem:[%s1386_s2 + $0x10] sm:$0xff]  ;;  %s1327_s28 = scalar_lea.hbm %s1389_s5, %s747_s15  ;;  %s617_s8 = scalar_lea.sflag [#allocation4], %s1188_s7 }
  0x45   : > { %767 = vmatpush3.bf16.msra.mxu0 %v269_v4  ;;  %291 = vperm.xlu0 %883, %v281_v13   ;;  %v282_v15 = vld [vmem:[%s1386_s2 + $0x8] sm:$0xff]  ;;  %v272_v16 = vpack.c.bf16 %v1222_v12, %v1219_v11  ;;  %v284_v17 = vld [vmem:[%s1386_s2 + $0x18] sm:$0xff]  ;;  %v285_v18 = vld [vmem:[%s1386_s2 + $0x20] sm:$0xff]  ;;  %s923_s6 = scalar_lea.vmem %s1320_s22, 1024  ;;  %p1402_p9 = scmp.ne.s32.totalorder %s1399_s9, 0 }
  0x46   : > { %768 = vmatprep.subr.bf16.mxu0 %v270_v6  ;;  %301 = vperm.xlu1 %884, %v283_v14   ;;  %v286_v19 = vld [vmem:[%s1386_s2 + $0x28] sm:$0xff]  ;;  %v887_v21 = vld [vmem:[%s1385_s1 + $0x10] sm:$0xff]   ;;  %v288_v23 = vld [vmem:[%s1386_s2 + $0x38] sm:$0xff]  ;;  %p924_p8 = scmp.ne.s32.totalorder %s1320_s22, %s923_s6  ;;  %s1028_s30 = smov [#allocation5]  }
  0x47   : > { %v886_v20 = vld [vmem:[%s1385_s1 + $0x8] sm:$0xff]   ;;  %v287_v22 = vld [vmem:[%s1386_s2 + $0x30] sm:$0xff]  ;;  %v447_v24 = vld [vmem:[%s1388_s4] sm:$0xff]  ;;  %s927_s10 = sshll.u32 %s1028_s30, 4  ;;  %s928_s10 = int_to_ptr.vmem [resolvable:$false] %s927_s10 }
  0x48   : > { %v448_v25 = vld [vmem:[%s1388_s4 + $0x8] sm:$0xff]  ;;  %v888_v26 = vld [vmem:[%s1385_s1 + $0x18] sm:$0xff]   ;;  %v449_v27 = vld [vmem:[%s1388_s4 + $0x10] sm:$0xff]  ;;  %p925_p12 = pnand %p924_p8, %p1402_p9  ;;  %s929_s17 = scalar_lea.vmem %s928_s10, 2048 }
  0x49   : > { %769 = vmatpush3.bf16.msra.mxu0 %v270_v6  ;;  %296 = vperm.xlu0 %883, %v282_v15   ;;  %v450_v28 = vld [vmem:[%s1388_s4 + $0x18] sm:$0xff]  ;;  %v451_v29 = vld [vmem:[%s1388_s4 + $0x20] sm:$0xff]  ;;  %v452_v30 = vld [vmem:[%s1388_s4 + $0x28] sm:$0xff]  ;;  %p930_p11 = scmp.lt.s32.totalorder %s1320_s22, %s928_s10  ;;  %p931_p13 = scmp.lt.s32.totalorder %s929_s17, %s923_s6 }
  0x4a   : > { %770 = vmatprep.subr.bf16.mxu0 %v271_v10  ;;  %306 = vperm.xlu1 %884, %v284_v17   ;;  %v453_v31 = vld [vmem:[%s1388_s4 + $0x30] sm:$0xff]  ;;  %v454_v32 = vld [vmem:[%s1388_s4 + $0x38] sm:$0xff]  ;;  %v889_v33 = vld [vmem:[%s1387_s3] sm:$0xff]   ;;  %p926_p0 = pneg %p925_p12 }
  0x4b   : > { %790 = vmatprep.mubr.msk.bf16.mxu1 %vm349_vm0, %v889_v33  ;;  %v890_v14 = vld [vmem:[%s1387_s3 + $0x8] sm:$0xff]   ;;  %v891_v15 = vld [vmem:[%s1387_s3 + $0x10] sm:$0xff]   ;;  %p932_p1 = por %p931_p13, %p930_p11 }
  0x4d   : > { %771 = vmatpush3.bf16.msra.mxu0 %v271_v10  ;;  %311 = vperm.xlu0 %883, %v285_v18   ;;  %p933_p4 = pnand %p932_p1, %p926_p0 }
  0x4e   : > { %772 = vmatprep.subr.bf16.mxu0 %v272_v16  ;;  %316 = vperm.xlu1 %884, %v286_v19  }
  0x51   : > { %773 = vmatpush3.bf16.msra.mxu0 %v272_v16  ;;  %321 = vperm.xlu0 %883, %v287_v22   ;;  %v892_v16 = vld [vmem:[%s1387_s3 + $0x18] sm:$0xff]  }
  0x52   : > { %326 = vperm.xlu1 %884, %v288_v23  }
  0x54   : > { %775 = vmatmul.mubr.msk.bf16.vlgmr.msra.gmra.mrb[0].mxu0 %vm349_vm0, %v886_v20 }
  0x55   : > { %778 = vmatprep.mubr.msk.bf16.mxu0 %vm349_vm0, %v887_v21  ;;  %457 = vperm.xlu0 %883, %v447_v24  }
  0x56   : > { %462 = vperm.xlu1 %884, %v448_v25  }
  0x59   : > { %467 = vperm.xlu0 %883, %v449_v27  }
  0x5a   : > { %472 = vperm.xlu1 %884, %v450_v28  }
  0x5c   : > { %779 = vmatmul.mubr.msk.bf16.gmra.mrb[4].mxu0 %vm349_vm0, %v888_v26 }
  0x5d   : > { %477 = vperm.xlu0 %883, %v451_v29  }
  0x5e   : > { %482 = vperm.xlu1 %884, %v452_v30  }
  0x61   : > { %487 = vperm.xlu0 %883, %v453_v31  }
  0x62   : > { %492 = vperm.xlu1 %884, %v454_v32  }
  0xc4   : > { %v292_v34 = vpop.permute.xlu0 %291 }
  0xc5   : > { %v302_v35 = vpop.permute.xlu1 %301 }
  0xc8   : > { %v297_v36 = vpop.permute.xlu0 %296 }
  0xc9   : > { %v307_v37 = vpop.permute.xlu1 %306 }
  0xcc   : > { %v312_v41 = vpop.permute.xlu0 %311 }
  0xcd   : > { %v317_v46 = vpop.permute.xlu1 %316 }
  0xd0   : > { %v322_v53 = vpop.permute.xlu0 %321 }
  0xd1   : > { %v327_v58 = vpop.permute.xlu1 %326 }
  0xd4   : > { %v458_v17 = vpop.permute.xlu0 %457 }
  0xd5   : > { %v463_v18 = vpop.permute.xlu1 %462 }
  0xd8   : > { %v468_v19 = vpop.permute.xlu0 %467 }
  0xd9   : > { %v473_v20 = vpop.permute.xlu1 %472 }
  0xdc   : > { %v478_v24 = vpop.permute.xlu0 %477 }
  0xdd   : > { %v483_v30 = vpop.permute.xlu1 %482 }
 0x127   : > { %v776_v38 = vpop.f32.mrb[0].mxu0 }
 0x128   : > { %v405_v39 = vadd.f32 %v776_v38, %v302_v35  ;;  %v396_v40 = vpop.f32.mrb[1].mxu0 }
 0x129   : > { %v397_v42 = vadd.f32 %v396_v40, %v292_v34  ;;  %v777_v43 = vpop.f32.mrb[2].mxu0 }
 0x12a   : > { %v408_v44 = vadd.f32 %v777_v43, %v307_v37  ;;  %v399_v45 = vpop.f32.mrb[3].mxu0  ;;  %v429_v48 = vmax.f32 %v405_v39, 0.0 }
 0x12b   : > { %v400_v47 = vadd.f32 %v399_v45, %v297_v36  ;;  %v427_v50 = vmax.f32 %v397_v42, 0.0 }
 0x12c   : > { %v430_v49 = vmax.f32 %v408_v44, 0.0 }
 0x12d   : > { %v428_v51 = vmax.f32 %v400_v47, 0.0 }
 0x12e   : > { %v444_v52 = vpack.c.bf16 %v430_v49, %v429_v48 }
 0x12f   : > { %v780_v54 = vpop.f32.mrb[4].mxu0  ;;  %v443_v55 = vpack.c.bf16 %v428_v51, %v427_v50 }
 0x130   : > { %v421_v56 = vadd.f32 %v780_v54, %v322_v53  ;;  %v412_v57 = vpop.f32.mrb[5].mxu0 }
 0x131   : > { %v413_v59 = vadd.f32 %v412_v57, %v312_v41  ;;  %v781_v60 = vpop.f32.mrb[6].mxu0  ;;  %782 = vmatprep.subr.bf16.mxu1 %v443_v55 }
 0x132   : > { %v424_v61 = vadd.f32 %v781_v60, %v327_v58  ;;  %v415_v62 = vpop.f32.mrb[7].mxu0  ;;  %783 = vmatpush3.bf16.msra.mxu1 %v443_v55  ;;  %v433_v0 = vmax.f32 %v421_v56, 0.0 }
 0x133   : > { %v416_v63 = vadd.f32 %v415_v62, %v317_v46  ;;  %784 = vmatprep.subr.bf16.mxu1 %v444_v52  ;;  %v431_v6 = vmax.f32 %v413_v59, 0.0 }
 0x134   : > { %v434_v4 = vmax.f32 %v424_v61, 0.0 }
 0x135   : > { %v432_v9 = vmax.f32 %v416_v63, 0.0 }
 0x136   : > { %v446_v10 = vpack.c.bf16 %v434_v4, %v433_v0  ;;  %785 = vmatpush3.bf16.msra.mxu1 %v444_v52 }
 0x137   : > { %v445_v13 = vpack.c.bf16 %v432_v9, %v431_v6 }
 0x139   : > { %786 = vmatprep.subr.bf16.mxu1 %v445_v13 }
 0x13a   : > { %787 = vmatpush3.bf16.msra.mxu1 %v445_v13 }
 0x13b   : > { %788 = vmatprep.subr.bf16.mxu1 %v446_v10 }
 0x13e   : > { %789 = vmatpush3.bf16.msra.mxu1 %v446_v10 }
 0x141   : > { %791 = vmatmul.mubr.msk.bf16.vlgmr.msra.gmra.mrb[0].mxu1 %vm349_vm0, %v890_v14 }
 0x142   : > { %794 = vmatprep.mubr.msk.bf16.mxu1 %vm349_vm0, %v891_v15 }
 0x149   : > { %795 = vmatmul.mubr.msk.bf16.gmra.mrb[4].mxu1 %vm349_vm0, %v892_v16 }
 0x214   : > { %v792_v21 = vpop.f32.mrb[0].mxu1 }
 0x215   : > { %v570_v22 = vadd.f32 %v792_v21, %v468_v19  ;;  %v561_v23 = vpop.f32.mrb[1].mxu1 }
 0x216   : > { %v562_v25 = vadd.f32 %v561_v23, %v458_v17  ;;  %v793_v26 = vpop.f32.mrb[2].mxu1 }
 0x217   : > { %v594_v27 = vadd.f32 %v570_v22, %v1202_v3  ;;  %v573_v28 = vadd.f32 %v793_v26, %v473_v20  ;;  %v564_v29 = vpop.f32.mrb[3].mxu1 }
 0x218   : > { %v592_v31 = vadd.f32 %v562_v25, %v1198_v1  ;;  %v565_v32 = vadd.f32 %v564_v29, %v463_v18  ;;  %v488_v1 = vpop.permute.xlu0 %487 }
 0x219   : > { %v602_v33 = vmax.f32 %v594_v27, 0.0  ;;  %v595_v34 = vadd.f32 %v573_v28, %v1206_v5 }
 0x21a   : > { %v600_v35 = vmax.f32 %v592_v31, 0.0  ;;  %v593_v36 = vadd.f32 %v565_v32, %v1200_v2  ;;  %v493_v2 = vpop.permute.xlu1 %492 }
 0x21b   : > { %610 = vst [vmem:[%s1309_s29 + $0x10] sm:$0xff] %v602_v33  ;;  %v603_v3 = vmax.f32 %v595_v34, 0.0 }
 0x21c   : > { %608 = vst [vmem:[%s1309_s29] sm:$0xff] %v600_v35  ;;  %v601_v37 = vmax.f32 %v593_v36, 0.0  ;;  %v796_v38 = vpop.f32.mrb[4].mxu1 }
 0x21d   : > { %611 = vst [vmem:[%s1309_s29 + $0x18] sm:$0xff] %v603_v3  ;;  %v586_v5 = vadd.f32 %v796_v38, %v488_v1  ;;  %v577_v39 = vpop.f32.mrb[5].mxu1 }
 0x21e   : > { %609 = vst [vmem:[%s1309_s29 + $0x8] sm:$0xff] %v601_v37  ;;  %v578_v40 = vadd.f32 %v577_v39, %v478_v24  ;;  %v797_v41 = vpop.f32.mrb[6].mxu1 }
 0x21f   : > { %v598_v42 = vadd.f32 %v586_v5, %v1219_v11  ;;  %v589_v43 = vadd.f32 %v797_v41, %v493_v2  ;;  %v580_v44 = vpop.f32.mrb[7].mxu1 }
 0x220   : > { %v596_v45 = vadd.f32 %v578_v40, %v1210_v7  ;;  %v581_v46 = vadd.f32 %v580_v44, %v483_v30 }
 0x221   : > { %v606_v47 = vmax.f32 %v598_v42, 0.0  ;;  %v599_v48 = vadd.f32 %v589_v43, %v1222_v12 }
 0x222   : > { %v604_v49 = vmax.f32 %v596_v45, 0.0  ;;  %v597_v11 = vadd.f32 %v581_v46, %v1212_v8 }
 0x223   : > { %614 = vst [vmem:[%s1309_s29 + $0x30] sm:$0xff] %v606_v47  ;;  %v607_v50 = vmax.f32 %v599_v48, 0.0 }
 0x224   : > { %612 = vst [vmem:[%s1309_s29 + $0x20] sm:$0xff] %v604_v49  ;;  %v605_v7 = vmax.f32 %v597_v11, 0.0 }
 0x225   : > { %615 = vst [vmem:[%s1309_s29 + $0x38] sm:$0xff] %v607_v50 }
 0x226   : > { %613 = vst [vmem:[%s1309_s29 + $0x28] sm:$0xff] %v605_v7 }
 0x227   : > { %936 = shalt.err (!%p933_p4)
}
 0x228   : > { %s937_s26 = scalar_lea.hbm %s1327_s28, 1024  ;;  %s941_s18 = scalar_lea.hbm %s1389_s5, 4096 }
 0x229   : > { %p938_p3 = scmp.ne.s32.totalorder %s1327_s28, %s937_s26  ;;  %p942_p2 = scmp.lt.u32.totalorder %s1327_s28, %s1389_s5 }
 0x22a   : > { %p943_p5 = scmp.lt.u32.totalorder %s941_s18, %s937_s26  ;;  %p945_p8 = scmp.lt.u32.totalorder %s937_s26, %s1327_s28 }
 0x22b   : > { %p939_p6 = pnand %p938_p3, %p1402_p9 }
 0x22c   : > { %p944_p10 = por %p943_p5, %p942_p2 }
 0x22d   : > { %p940_p7 = pneg %p939_p6 }
 0x22e   : > { %p946_p12 = por %p945_p8, %p944_p10 }
 0x230   : > { %p947_p0 = pnand %p946_p12, %p940_p7 }
 0x232   : > { %950 = shalt.err (!%p947_p0)
}
 0x233   : > { %s1029_s15 = smov 128   ;;  %s1030_s21 = smov 256  }
 0x234   : > { %s1031_s13 = smov 8  }
 0x235   : > { %800 = dma.vmem_to_hbm [thread:$0]  (%p1402_p9), %s1320_s22, 1024, %s1327_s28, %s617_s8, %s1029_s15, %s1030_s21, %s1031_s13  }
 0x236 PF: > { %s1403_s6 = sld [smem:[#allocation8_spill]]  ;;  %p811_p11 = scmp.ge.s32.totalorder %s1021_s25, 2 }
 0x237   : > { %p1404_p13 = scmp.ne.s32.totalorder %s1400_s12, 0 }
 0x239   : > { %p807_p1 = pnand %p811_p11, %p1404_p13 }
 0x23c   : > { %s646_s30 = sand.u32 1, %s1403_s6  }
 0x23d   : > { %s647_s10 = scalar_lea.sflag [#allocation4], %s646_s30 }
 0x23e   : > { %988 = dma.done.wait (!%p807_p1), %s647_s10, 1024  }
 0x23f   : > { %990 = vsyncadd (!%p807_p1), %s647_s10, 4294966272  ;;  %s21_s25 = sadd.s32 1, %s1021_s25   ;;  %s1405_s9 = sld [smem:[#allocation9_spill]] }
 0x240   : > { %p18_p4 = scmp.ge.s32.totalorder %s21_s25, 6   ;;  %s1406_s7 = sld [smem:[#allocation10_spill]] }
 0x241   : > { %s1407_s18 = smov %s997_s19  ;;  %s1408_s19 = smov %s1001_s20 }
 0x242   : > { %s1409_s20 = smov %s1140_s14  ;;  %s1410_s21 = smov %s1013_s23 }
 0x243   : > { %s1411_s22 = smov %s1017_s24  ;;  %20 = sbr.rel (!%p18_p4) target bundleno = 7 (0x7), region = 85 }
 0x245   : > { %s1412_s23 = smov %s1405_s9 }
 0x246   : > { %s1413_s24 = smov %s1406_s7 }
 0x24a   :  { %652 = vsyncpa [#allocation3], 1 }
 0x24b   :  { %654 = vsyncpa [#allocation3 + $0x1], 1 }
 0x24c   :  { %655 = vsyncpa [#allocation4], 1 }
 0x24d   :  { %657 = vsyncpa [#allocation4 + $0x1], 1 }

</bundles_post_ra>
